<compile_context>
chip_gen: v7x
topology: tpu7x:2x2x1
jax: 0.10.0
libtpu: 0.0.40
codegen_flags: <defaults>
</compile_context>

<pallas_src>
import jax
import jax.numpy as jnp
from jax.experimental import pallas as pl
from jax.experimental.pallas import tpu as pltpu

INPUT_SIZE = 64
OUTPUT_SIZE = 3
HIDDEN1 = 128
HIDDEN2 = 128
HIDDEN3 = 64
OUT_PAD = 128          # lane-dense padded output width
TILE_B_MAX = 2048      # max batch rows per grid step
MULTI_STEP_BATCH = 256 # above this, force >=2 grid steps (v7x megacore)


def _round_up(n, m):
    return ((n + m - 1) // m) * m


def dqn_kernel(x_ref,
               w1_ref, b1_ref,
               w2_ref, b2_ref,
               w3_ref, b3_ref,
               w4_ref, b4_ref,
               o_ref):
    # Input block arrives as f32; cast to bf16 in-kernel (saves a separate
    # XLA cast pass over HBM). Matmuls accumulate in f32 on the MXU; bias-add
    # and ReLU stay in f32 (portable to v5e's f32-only VPU).
    x = x_ref[...].astype(jnp.bfloat16)

    h1 = jnp.dot(x, w1_ref[...], preferred_element_type=jnp.float32) + b1_ref[...]
    h1 = jnp.maximum(h1, 0.0).astype(jnp.bfloat16)

    h2 = jnp.dot(h1, w2_ref[...], preferred_element_type=jnp.float32) + b2_ref[...]
    h2 = jnp.maximum(h2, 0.0).astype(jnp.bfloat16)

    h3 = jnp.dot(h2, w3_ref[...], preferred_element_type=jnp.float32) + b3_ref[...]
    h3 = jnp.maximum(h3, 0.0).astype(jnp.bfloat16)

    out = jnp.dot(h3, w4_ref[...], preferred_element_type=jnp.float32) + b4_ref[...]
    o_ref[...] = out.astype(o_ref.dtype)          # bf16, full 128-lane store


def dqn_forward(x, params):
    """x: (B, ...) flattened to (B, INPUT_SIZE), any float dtype.
    Returns (B, OUTPUT_SIZE) f32.

    `params` must come from init_params(): weights are (in, out) bf16 with the
    last layer padded to OUT_PAD columns; biases are (1, out) f32 (last bias
    padded to (1, OUT_PAD)).
    """
    b = x.shape[0]
    x2d = x.reshape(b, -1)
    assert x2d.shape[1] == INPUT_SIZE
    x2d = x2d.astype(jnp.float32)   # kernel casts to bf16 internally

    # Balanced tiling: choose step count first, then a near-equal tile size,
    # so batch padding is <= 7 rows. Force >=2 steps for large batches so the
    # "parallel" axis shards across both TensorCores on v7x.
    steps = max(pl.cdiv(b, TILE_B_MAX), 1)
    if b >= MULTI_STEP_BATCH:
        steps = max(steps, 2)
    tile_b = _round_up(pl.cdiv(b, steps), 8)
    b_pad = steps * tile_b
    if b_pad != b:
        x2d = jnp.pad(x2d, ((0, b_pad - b), (0, 0)))

    (w1, b1), (w2, b2), (w3, b3), (w4, b4) = params

    grid = (steps,)

    # Activations: tiled along batch (auto double-buffered).
    x_spec = pl.BlockSpec((tile_b, INPUT_SIZE), lambda i: (i, 0))
    o_spec = pl.BlockSpec((tile_b, OUT_PAD), lambda i: (i, 0))
    # Weights/biases: full array, same block for every grid step -> resident.
    resident = lambda arr: pl.BlockSpec(arr.shape, lambda i: (0, 0))

    flops_per_row = 2 * (INPUT_SIZE * HIDDEN1 + HIDDEN1 * HIDDEN2 +
                         HIDDEN2 * HIDDEN3 + HIDDEN3 * OUT_PAD)
    weight_bytes = 2 * (INPUT_SIZE * HIDDEN1 + HIDDEN1 * HIDDEN2 +
                        HIDDEN2 * HIDDEN3 + HIDDEN3 * OUT_PAD) \
                   + 4 * (HIDDEN1 + HIDDEN2 + HIDDEN3 + OUT_PAD)
    cost = pl.CostEstimate(
        flops=b_pad * flops_per_row,
        transcendentals=0,
        # f32 input read + resident weights + bf16 padded output write
        bytes_accessed=b_pad * INPUT_SIZE * 4 + weight_bytes + b_pad * OUT_PAD * 2,
    )

    out_padded = pl.pallas_call(
        dqn_kernel,
        out_shape=jax.ShapeDtypeStruct((b_pad, OUT_PAD), jnp.bfloat16),
        grid=grid,
        in_specs=[x_spec,
                  resident(w1), resident(b1),
                  resident(w2), resident(b2),
                  resident(w3), resident(b3),
                  resident(w4), resident(b4)],
        out_specs=o_spec,
        compiler_params=pltpu.CompilerParams(
            dimension_semantics=("parallel",),
            vmem_limit_bytes=48 << 20),   # headroom beyond v5e's 16 MiB default
        cost_estimate=cost,
    )(x2d, w1, b1, w2, b2, w3, b3, w4, b4)

    return out_padded[:b, :OUTPUT_SIZE].astype(jnp.float32)


def init_params(key):
    """Deterministic init mimicking PyTorch nn.Linear (uniform ±1/sqrt(fan_in)).

    Layout prep done here (not in the hot path):
      * weights stored transposed vs PyTorch: (in, out), cast to bf16,
      * biases stored as (1, out) f32,
      * last layer zero-padded from OUTPUT_SIZE to OUT_PAD columns.
    """
    dims = [(INPUT_SIZE, HIDDEN1), (HIDDEN1, HIDDEN2),
            (HIDDEN2, HIDDEN3), (HIDDEN3, OUTPUT_SIZE)]
    params = []
    for li, (fan_in, fan_out) in enumerate(dims):
        key, kw, kb = jax.random.split(key, 3)
        bound = 1.0 / jnp.sqrt(fan_in)
        w = jax.random.uniform(kw, (fan_in, fan_out), jnp.float32, -bound, bound)
        bvec = jax.random.uniform(kb, (fan_out,), jnp.float32, -bound, bound)
        if li == len(dims) - 1:  # pad final layer to lane-dense width
            w = jnp.pad(w, ((0, 0), (0, OUT_PAD - fan_out)))
            bvec = jnp.pad(bvec, ((0, OUT_PAD - fan_out),))
        params.append((w.astype(jnp.bfloat16),
                       bvec.reshape(1, -1).astype(jnp.float32)))
    return params


if __name__ == "__main__":
    key = jax.random.PRNGKey(0)
    key, kx = jax.random.split(key)

    # Input consistent with Flatten + Linear(64, ...): batch=2, 8x8 "state"
    # that flattens to 64 features.
    x = jax.random.normal(kx, (2, 8, 8), dtype=jnp.float32)

    params = init_params(key)

    out = dqn_forward(x, params)
    out = jax.block_until_ready(out)

    assert out.shape == (2, OUTPUT_SIZE)
    assert out.dtype == jnp.float32
    assert bool(jnp.all(jnp.isfinite(out)))

    print("KERNEL_OK")
</pallas_src>

<mosaic_0001>
module attributes {stable_mosaic.version = 11 : i64} {
  func.func @dqn_kernel(%arg0: i32, %arg1: memref<8x64xf32, #tpu.memory_space<vmem>>, %arg2: memref<64x128xbf16, #tpu.memory_space<vmem>>, %arg3: memref<1x128xf32, #tpu.memory_space<vmem>>, %arg4: memref<128x128xbf16, #tpu.memory_space<vmem>>, %arg5: memref<1x128xf32, #tpu.memory_space<vmem>>, %arg6: memref<128x64xbf16, #tpu.memory_space<vmem>>, %arg7: memref<1x64xf32, #tpu.memory_space<vmem>>, %arg8: memref<64x128xbf16, #tpu.memory_space<vmem>>, %arg9: memref<1x128xf32, #tpu.memory_space<vmem>>, %arg10: memref<8x128xbf16, #tpu.memory_space<vmem>>) attributes {dimension_semantics = [#tpu.dimension_semantics<parallel>], iteration_bounds = array<i64: 1>, scalar_prefetch = 0 : i64, scratch_operands = 0 : i64, tpu.core_type = #tpu.core_type<tc>, window_params = [{transform_indices = @transform_0, window_bounds = array<i64: 8, 64>}, {pipeline_mode = #tpu.pipeline_mode<synchronous>, transform_indices = @transform_1, window_bounds = array<i64: 64, 128>}, {pipeline_mode = #tpu.pipeline_mode<synchronous>, transform_indices = @transform_2, window_bounds = array<i64: 1, 128>}, {pipeline_mode = #tpu.pipeline_mode<synchronous>, transform_indices = @transform_3, window_bounds = array<i64: 128, 128>}, {pipeline_mode = #tpu.pipeline_mode<synchronous>, transform_indices = @transform_4, window_bounds = array<i64: 1, 128>}, {pipeline_mode = #tpu.pipeline_mode<synchronous>, transform_indices = @transform_5, window_bounds = array<i64: 128, 64>}, {pipeline_mode = #tpu.pipeline_mode<synchronous>, transform_indices = @transform_6, window_bounds = array<i64: 1, 64>}, {pipeline_mode = #tpu.pipeline_mode<synchronous>, transform_indices = @transform_7, window_bounds = array<i64: 64, 128>}, {pipeline_mode = #tpu.pipeline_mode<synchronous>, transform_indices = @transform_8, window_bounds = array<i64: 1, 128>}, {transform_indices = @transform_9, window_bounds = array<i64: 8, 128>}]} {
    %c0 = arith.constant 0 : index
    %c0_0 = arith.constant 0 : index
    %0 = vector.load %arg1[%c0, %c0_0] : memref<8x64xf32, #tpu.memory_space<vmem>>, vector<8x64xf32>
    %1 = arith.truncf %0 : vector<8x64xf32> to vector<8x64xbf16>
    %c0_1 = arith.constant 0 : index
    %c0_2 = arith.constant 0 : index
    %2 = vector.load %arg2[%c0_1, %c0_2] : memref<64x128xbf16, #tpu.memory_space<vmem>>, vector<64x128xbf16>
    %cst = arith.constant dense<0.000000e+00> : vector<8x128xf32>
    %3 = tpu.matmul %1, %2, %cst {dimension_numbers = #tpu.dot_dimension_numbers<[1], [0], [0], [1], [0, 0, 1, 1], [], []>} : vector<8x64xbf16>, vector<64x128xbf16>, vector<8x128xf32> -> vector<8x128xf32>
    %c0_3 = arith.constant 0 : index
    %c0_4 = arith.constant 0 : index
    %4 = vector.load %arg3[%c0_3, %c0_4] : memref<1x128xf32, #tpu.memory_space<vmem>>, vector<1x128xf32>
    %5 = vector.broadcast %4 : vector<1x128xf32> to vector<8x128xf32>
    %6 = arith.addf %3, %5 : vector<8x128xf32>
    %cst_5 = arith.constant 0.000000e+00 : f32
    %7 = vector.broadcast %cst_5 : f32 to vector<8x128xf32>
    %8 = arith.maximumf %6, %7 : vector<8x128xf32>
    %9 = arith.truncf %8 : vector<8x128xf32> to vector<8x128xbf16>
    %c0_6 = arith.constant 0 : index
    %c0_7 = arith.constant 0 : index
    %10 = vector.load %arg4[%c0_6, %c0_7] : memref<128x128xbf16, #tpu.memory_space<vmem>>, vector<128x128xbf16>
    %cst_8 = arith.constant dense<0.000000e+00> : vector<8x128xf32>
    %11 = tpu.matmul %9, %10, %cst_8 {dimension_numbers = #tpu.dot_dimension_numbers<[1], [0], [0], [1], [0, 0, 1, 1], [], []>} : vector<8x128xbf16>, vector<128x128xbf16>, vector<8x128xf32> -> vector<8x128xf32>
    %c0_9 = arith.constant 0 : index
    %c0_10 = arith.constant 0 : index
    %12 = vector.load %arg5[%c0_9, %c0_10] : memref<1x128xf32, #tpu.memory_space<vmem>>, vector<1x128xf32>
    %13 = vector.broadcast %12 : vector<1x128xf32> to vector<8x128xf32>
    %14 = arith.addf %11, %13 : vector<8x128xf32>
    %cst_11 = arith.constant 0.000000e+00 : f32
    %15 = vector.broadcast %cst_11 : f32 to vector<8x128xf32>
    %16 = arith.maximumf %14, %15 : vector<8x128xf32>
    %17 = arith.truncf %16 : vector<8x128xf32> to vector<8x128xbf16>
    %c0_12 = arith.constant 0 : index
    %c0_13 = arith.constant 0 : index
    %18 = vector.load %arg6[%c0_12, %c0_13] : memref<128x64xbf16, #tpu.memory_space<vmem>>, vector<128x64xbf16>
    %cst_14 = arith.constant dense<0.000000e+00> : vector<8x64xf32>
    %19 = tpu.matmul %17, %18, %cst_14 {dimension_numbers = #tpu.dot_dimension_numbers<[1], [0], [0], [1], [0, 0, 1, 1], [], []>} : vector<8x128xbf16>, vector<128x64xbf16>, vector<8x64xf32> -> vector<8x64xf32>
    %c0_15 = arith.constant 0 : index
    %c0_16 = arith.constant 0 : index
    %20 = vector.load %arg7[%c0_15, %c0_16] : memref<1x64xf32, #tpu.memory_space<vmem>>, vector<1x64xf32>
    %21 = vector.broadcast %20 : vector<1x64xf32> to vector<8x64xf32>
    %22 = arith.addf %19, %21 : vector<8x64xf32>
    %cst_17 = arith.constant 0.000000e+00 : f32
    %23 = vector.broadcast %cst_17 : f32 to vector<8x64xf32>
    %24 = arith.maximumf %22, %23 : vector<8x64xf32>
    %25 = arith.truncf %24 : vector<8x64xf32> to vector<8x64xbf16>
    %c0_18 = arith.constant 0 : index
    %c0_19 = arith.constant 0 : index
    %26 = vector.load %arg8[%c0_18, %c0_19] : memref<64x128xbf16, #tpu.memory_space<vmem>>, vector<64x128xbf16>
    %cst_20 = arith.constant dense<0.000000e+00> : vector<8x128xf32>
    %27 = tpu.matmul %25, %26, %cst_20 {dimension_numbers = #tpu.dot_dimension_numbers<[1], [0], [0], [1], [0, 0, 1, 1], [], []>} : vector<8x64xbf16>, vector<64x128xbf16>, vector<8x128xf32> -> vector<8x128xf32>
    %c0_21 = arith.constant 0 : index
    %c0_22 = arith.constant 0 : index
    %28 = vector.load %arg9[%c0_21, %c0_22] : memref<1x128xf32, #tpu.memory_space<vmem>>, vector<1x128xf32>
    %29 = vector.broadcast %28 : vector<1x128xf32> to vector<8x128xf32>
    %30 = arith.addf %27, %29 : vector<8x128xf32>
    %31 = arith.truncf %30 : vector<8x128xf32> to vector<8x128xbf16>
    %c0_23 = arith.constant 0 : index
    %c0_24 = arith.constant 0 : index
    %32 = vector.load %arg10[%c0_23, %c0_24] : memref<8x128xbf16, #tpu.memory_space<vmem>>, vector<8x128xbf16>
    tpu.vector_store %arg10[%c0_23, %c0_24], %31 {strides = array<i32>} : memref<8x128xbf16, #tpu.memory_space<vmem>>, vector<8x128xbf16>,
    return
  }
  func.func @transform_0(%arg0: i32) -> (i32, i32) {
    %c0_i32 = arith.constant 0 : i32
    %c0_i32_0 = arith.constant 0 : i32
    return %arg0, %c0_i32 : i32, i32
  }
  func.func @transform_1(%arg0: i32) -> (i32, i32) {
    %c0_i32 = arith.constant 0 : i32
    %c0_i32_0 = arith.constant 0 : i32
    %c0_i32_1 = arith.constant 0 : i32
    return %c0_i32, %c0_i32_0 : i32, i32
  }
  func.func @transform_2(%arg0: i32) -> (i32, i32) {
    %c0_i32 = arith.constant 0 : i32
    %c0_i32_0 = arith.constant 0 : i32
    %c0_i32_1 = arith.constant 0 : i32
    return %c0_i32, %c0_i32_0 : i32, i32
  }
  func.func @transform_3(%arg0: i32) -> (i32, i32) {
    %c0_i32 = arith.constant 0 : i32
    %c0_i32_0 = arith.constant 0 : i32
    %c0_i32_1 = arith.constant 0 : i32
    return %c0_i32, %c0_i32_0 : i32, i32
  }
  func.func @transform_4(%arg0: i32) -> (i32, i32) {
    %c0_i32 = arith.constant 0 : i32
    %c0_i32_0 = arith.constant 0 : i32
    %c0_i32_1 = arith.constant 0 : i32
    return %c0_i32, %c0_i32_0 : i32, i32
  }
  func.func @transform_5(%arg0: i32) -> (i32, i32) {
    %c0_i32 = arith.constant 0 : i32
    %c0_i32_0 = arith.constant 0 : i32
    %c0_i32_1 = arith.constant 0 : i32
    return %c0_i32, %c0_i32_0 : i32, i32
  }
  func.func @transform_6(%arg0: i32) -> (i32, i32) {
    %c0_i32 = arith.constant 0 : i32
    %c0_i32_0 = arith.constant 0 : i32
    %c0_i32_1 = arith.constant 0 : i32
    return %c0_i32, %c0_i32_0 : i32, i32
  }
  func.func @transform_7(%arg0: i32) -> (i32, i32) {
    %c0_i32 = arith.constant 0 : i32
    %c0_i32_0 = arith.constant 0 : i32
    %c0_i32_1 = arith.constant 0 : i32
    return %c0_i32, %c0_i32_0 : i32, i32
  }
  func.func @transform_8(%arg0: i32) -> (i32, i32) {
    %c0_i32 = arith.constant 0 : i32
    %c0_i32_0 = arith.constant 0 : i32
    %c0_i32_1 = arith.constant 0 : i32
    return %c0_i32, %c0_i32_0 : i32, i32
  }
  func.func @transform_9(%arg0: i32) -> (i32, i32) {
    %c0_i32 = arith.constant 0 : i32
    %c0_i32_0 = arith.constant 0 : i32
    return %arg0, %c0_i32 : i32, i32
  }
}

</mosaic_0001>

<bundles_post_ra>
// kernel: tpu_custom_call.1
= control target key start
LH: loop header
LB: loop body
LE: loop exit
PB: predicated region body
PF: predicated region fallthrough
CT: control target
= control target key end

     0   :  { %14 = vsyncpa [#allocation3], 0  ;;  %s849_s0 = inlined_call_operand.vmem [shape: f32[8,64], index: 0, kind: input, shape index: {}]   ;;  %s850_s1 = inlined_call_operand.vmem [shape: bf16[64,128], index: 1, kind: input, shape index: {}]   ;;  %s851_s2 = inlined_call_operand.vmem [shape: f32[1,128], index: 2, kind: input, shape index: {}]   ;;  %s852_s3 = inlined_call_operand.vmem [shape: bf16[128,128], index: 3, kind: input, shape index: {}]   ;;  %s853_s4 = inlined_call_operand.vmem [shape: f32[1,128], index: 4, kind: input, shape index: {}]   ;;  %s854_s5 = inlined_call_operand.vmem [shape: bf16[128,64], index: 5, kind: input, shape index: {}]   ;;  %s855_s6 = inlined_call_operand.vmem [shape: f32[1,64], index: 6, kind: input, shape index: {}]   ;;  %s856_s7 = inlined_call_operand.hbm [shape: bf16[64,128], index: 7, kind: input, shape index: {}]   ;;  %s857_s8 = inlined_call_operand.vmem [shape: f32[1,128], index: 8, kind: input, shape index: {}]   ;;  %s858_s9 = inlined_call_operand.hbm [shape: bf16[8,128], index: 9, kind: output, shape index: {}]  }
   0x1   :  { %15 = vsyncpa [#allocation4], 0  ;;  %s660_s30 = smov [#allocation2]   ;;  %s612_s13 = scalar_lea.hbm %s856_s7, 512 }
   0x2   :  { %s35_s10 = sshll.u32 %s660_s30, 4  ;;  %p613_p0 = scmp.ne.s32.totalorder %s856_s7, %s612_s13  ;;  %s36_s10 = int_to_ptr.vmem [resolvable:$true] %s35_s10 }
   0x3   :  { %p616_p1 = scmp.lt.u32.totalorder %s612_s13, %s856_s7 }
   0x5   :  { %p618_p2 = pnand %p616_p1, %p613_p0 }
   0x7   :  { %621 = shalt.err (!%p618_p2)
}
   0x8   :  { %s622_s18 = scalar_lea.vmem %s36_s10, 512  ;;  %p627_p4 = scmp.lt.s32.totalorder %s36_s10, %s36_s10 }
   0x9   :  { %p623_p3 = scmp.ne.s32.totalorder %s36_s10, %s622_s18  ;;  %p628_p5 = scmp.lt.s32.totalorder %s622_s18, %s622_s18 }
   0xb   :  { %p629_p6 = por %p628_p5, %p627_p4 }
   0xd   :  { %p630_p7 = pnand %p629_p6, %p623_p3 }
   0xf   :  { %633 = shalt.err (!%p630_p7)
}
  0x10   :  { %s661_s19 = smov 64   ;;  %s662_s20 = smov 4  }
  0x11   :  { %41 = dma.hbm_to_vmem [thread:$0]  %s856_s7, 512, %s36_s10, [#allocation3], %s661_s19, %s661_s19, %s662_s20  }
  0x12   :  { %656 = dma.done.wait [#allocation3], 512  }
  0x13   :  { %657 = vsyncadd [#allocation3], 4294966784  ;;  %v663_v0 = vmov 0.0   ;;  %vm664_vm0 = vmmov 0   ;;  %v588_v1 = vld [vmem:[%s850_s1] sm:$0xff]   ;;  %v589_v2 = vld [vmem:[%s850_s1 + $0x8] sm:$0xff]  }
  0x14   :  { %518 = vmatprep.subr.bf16.mxu0 %v663_v0  ;;  %526 = vmatprep.mubr.msk.bf16.mxu0 %vm664_vm0, %v663_v0  ;;  %v592_v3 = vld [vmem:[%s852_s3] sm:$0xff]   ;;  %v590_v4 = vld [vmem:[%s850_s1 + $0x10] sm:$0xff]   ;;  %v593_v5 = vld [vmem:[%s852_s3 + $0x8] sm:$0xff]   ;;  %vm89_vm1 = vcmask 523264   ;;  %s665_s21 = smov [#allocation5]  }
  0x15   :  { %530 = vmatprep.subr.bf16.mxu1 %v663_v0  ;;  %546 = vmatprep.mubr.msk.bf16.mxu1 %vm664_vm0, %v663_v0  ;;  %v591_v6 = vld [vmem:[%s850_s1 + $0x18] sm:$0xff]   ;;  %v48_v7 = vld [vmem:[%s849_s0] sm:$0xff]  ;;  %v594_v8 = vld [vmem:[%s852_s3 + $0x10] sm:$0xff]   ;;  %s451_s22 = sshll.u32 %s665_s21, 4  ;;  %s452_s22 = int_to_ptr.vmem [resolvable:$true] %s451_s22 }
  0x16   :  { %519 = vmatpush3.bf16.msra.mxu0 %v588_v1  ;;  %531 = vmatpush3.bf16.msra.mxu1 %v592_v3  ;;  %v49_v9 = vpack.c.bf16 %v48_v7, %v48_v7  ;;  %v595_v10 = vld [vmem:[%s852_s3 + $0x18] sm:$0xff]   ;;  %v596_v11 = vld [vmem:[%s852_s3 + $0x20] sm:$0xff]   ;;  %v597_v12 = vld [vmem:[%s852_s3 + $0x28] sm:$0xff]   ;;  %p639_p9 = scmp.lt.s32.totalorder %s452_s22, %s452_s22 }
  0x17   :  { %520 = vmatprep.subr.bf16.mxu0 %v663_v0  ;;  %532 = vmatprep.subr.bf16.mxu1 %v663_v0  ;;  %v598_v13 = vld [vmem:[%s852_s3 + $0x30] sm:$0xff]   ;;  %v599_v14 = vld [vmem:[%s852_s3 + $0x38] sm:$0xff]   ;;  %v600_v15 = vld [vmem:[%s854_s5] sm:$0xff]  }
  0x18   :  { %v601_v16 = vld [vmem:[%s854_s5 + $0x8] sm:$0xff]   ;;  %v602_v17 = vld [vmem:[%s854_s5 + $0x10] sm:$0xff]   ;;  %v603_v18 = vld [vmem:[%s854_s5 + $0x18] sm:$0xff]  }
  0x19   :  { %v604_v19 = vld [vmem:[%s854_s5 + $0x20] sm:$0xff]   ;;  %v605_v20 = vld [vmem:[%s854_s5 + $0x28] sm:$0xff]   ;;  %v606_v29 = vld [vmem:[%s854_s5 + $0x30] sm:$0xff]  }
  0x1a   :  { %521 = vmatpush3.bf16.msra.mxu0 %v589_v2  ;;  %533 = vmatpush3.bf16.msra.mxu1 %v593_v5  ;;  %v460_v21 = vld [vmem:[%s851_s2] ss:$0 sm:$0xff]  ;;  %v607_v30 = vld [vmem:[%s854_s5 + $0x38] sm:$0xff]   ;;  %v609_v32 = vld [vmem:[#allocation2 + $0x8] sm:$0xff]  }
  0x1b   :  { %522 = vmatprep.subr.bf16.mxu0 %v663_v0  ;;  %534 = vmatprep.subr.bf16.mxu1 %v663_v0  ;;  %v608_v31 = vld [vmem:[#allocation2] sm:$0xff]   ;;  %v610_v41 = vld [vmem:[#allocation2 + $0x10] sm:$0xff]   ;;  %v611_v42 = vld [vmem:[#allocation2 + $0x18] sm:$0xff]  }
  0x1c   :  { %v466_v33 = vld [vmem:[%s853_s4] ss:$0 sm:$0xff] }
  0x1d   :  { %v475_v43 = vld [vmem:[%s855_s6] ss:$0 sm:$0xff]  ;;  %s634_s6 = scalar_lea.vmem %s452_s22, 64 }
  0x1e   :  { %523 = vmatpush3.bf16.msra.mxu0 %v590_v4  ;;  %535 = vmatpush3.bf16.msra.mxu1 %v594_v8  ;;  %v484_v51 = vld [vmem:[%s857_s8] ss:$0 sm:$0xff]  ;;  %p635_p8 = scmp.ne.s32.totalorder %s452_s22, %s634_s6  ;;  %p640_p10 = scmp.lt.s32.totalorder %s634_s6, %s634_s6 }
  0x1f   :  { %524 = vmatprep.subr.bf16.mxu0 %v663_v0  ;;  %536 = vmatprep.subr.bf16.mxu1 %v663_v0 }
  0x20   :  { %p641_p11 = por %p640_p10, %p639_p9 }
  0x22   :  { %525 = vmatpush3.bf16.msra.mxu0 %v591_v6  ;;  %537 = vmatpush3.bf16.msra.mxu1 %v595_v10  ;;  %p642_p12 = pnand %p641_p11, %p635_p8 }
  0x23   :  { %550 = vmatprep.subr.bf16.mxu0 %v663_v0  ;;  %538 = vmatprep.subr.bf16.mxu1 %v663_v0 }
  0x25   :  { %527 = vmatmul.mubr.msk.bf16.vlgmr.msra.gmra.mrb[0].mxu0 %vm89_vm1, %v49_v9 }
  0x26   :  { %566 = vmatprep.mubr.msk.bf16.mxu0 %vm664_vm0, %v663_v0  ;;  %539 = vmatpush3.bf16.msra.mxu1 %v596_v11 }
  0x27   :  { %540 = vmatprep.subr.bf16.mxu1 %v663_v0  ;;  %551 = vmatpush3.bf16.msra.mxu0 %v600_v15 }
  0x28   :  { %552 = vmatprep.subr.bf16.mxu0 %v663_v0 }
  0x2a   :  { %541 = vmatpush3.bf16.msra.mxu1 %v597_v12 }
  0x2b   :  { %542 = vmatprep.subr.bf16.mxu1 %v663_v0  ;;  %553 = vmatpush3.bf16.msra.mxu0 %v601_v16 }
  0x2c   :  { %554 = vmatprep.subr.bf16.mxu0 %v663_v0 }
  0x2e   :  { %543 = vmatpush3.bf16.msra.mxu1 %v598_v13 }
  0x2f   :  { %544 = vmatprep.subr.bf16.mxu1 %v663_v0  ;;  %555 = vmatpush3.bf16.msra.mxu0 %v602_v17 }
  0x30   :  { %556 = vmatprep.subr.bf16.mxu0 %v663_v0 }
  0x32   :  { %545 = vmatpush3.bf16.msra.mxu1 %v599_v14 }
  0x33   :  { %570 = vmatprep.subr.bf16.mxu1 %v663_v0  ;;  %557 = vmatpush3.bf16.msra.mxu0 %v603_v18 }
  0x34   :  { %558 = vmatprep.subr.bf16.mxu0 %v663_v0 }
  0x37   :  { %559 = vmatpush3.bf16.msra.mxu0 %v604_v19 }
  0x38   :  { %560 = vmatprep.subr.bf16.mxu0 %v663_v0 }
  0x3b   :  { %561 = vmatpush3.bf16.msra.mxu0 %v605_v20 }
  0x3c   :  { %562 = vmatprep.subr.bf16.mxu0 %v663_v0 }
  0x3f   :  { %563 = vmatpush3.bf16.msra.mxu0 %v606_v29 }
  0x40   :  { %564 = vmatprep.subr.bf16.mxu0 %v663_v0 }
  0x43   :  { %565 = vmatpush3.bf16.msra.mxu0 %v607_v30 }
  0xf8   :  { %v127_v22 = vpop.f32.mrb[0].mxu0 }
  0xf9   :  { %v128_v23 = vadd.f32 %v460_v21, %v127_v22  ;;  %v528_v24 = vpop.f32.mrb[1].mxu0 }
  0xfa   :  { %v130_v25 = vpop.f32.mrb[2].mxu0 }
  0xfb   :  { %v133_v26 = vmax.f32 %v128_v23, 0.0  ;;  %v529_v27 = vpop.f32.mrb[3].mxu0 }
  0xfd   :  { %v134_v28 = vpack.c.bf16 %v133_v26, %v133_v26 }
  0xff   :  { %547 = vmatmul.mubr.bf16.vlgmr.msra.gmra.mrb[0].mxu1 %v134_v28 }
 0x100   :  { %578 = vmatprep.mubr.msk.bf16.mxu1 %vm664_vm0, %v663_v0  ;;  %571 = vmatpush3.bf16.msra.mxu1 %v608_v31 }
 0x101   :  { %572 = vmatprep.subr.bf16.mxu1 %v663_v0 }
 0x104   :  { %573 = vmatpush3.bf16.msra.mxu1 %v609_v32 }
 0x105   :  { %574 = vmatprep.subr.bf16.mxu1 %v663_v0 }
 0x108   :  { %575 = vmatpush3.bf16.msra.mxu1 %v610_v41 }
 0x109   :  { %576 = vmatprep.subr.bf16.mxu1 %v663_v0 }
 0x10c   :  { %577 = vmatpush3.bf16.msra.mxu1 %v611_v42 }
 0x1d2   :  { %v240_v34 = vpop.f32.mrb[0].mxu1 }
 0x1d3   :  { %v241_v35 = vadd.f32 %v466_v33, %v240_v34  ;;  %v548_v36 = vpop.f32.mrb[1].mxu1 }
 0x1d4   :  { %v243_v37 = vpop.f32.mrb[2].mxu1 }
 0x1d5   :  { %v246_v38 = vmax.f32 %v241_v35, 0.0  ;;  %v549_v39 = vpop.f32.mrb[3].mxu1 }
 0x1d7   :  { %v247_v40 = vpack.c.bf16 %v246_v38, %v246_v38 }
 0x1d9   :  { %567 = vmatmul.mubr.bf16.vlgmr.msra.gmra.mrb[4].mxu0 %v247_v40 }
 0x2ac   :  { %v353_v44 = vpop.f32.mrb[4].mxu0 }
 0x2ad   :  { %v354_v45 = vadd.f32 %v475_v43, %v353_v44  ;;  %v568_v46 = vpop.f32.mrb[5].mxu0 }
 0x2ae   :  { %v356_v47 = vpop.f32.mrb[6].mxu0 }
 0x2af   :  { %v359_v48 = vmax.f32 %v354_v45, 0.0  ;;  %v569_v49 = vpop.f32.mrb[7].mxu0 }
 0x2b1   :  { %v360_v50 = vpack.c.bf16 %v359_v48, %v359_v48 }
 0x2b3   :  { %579 = vmatmul.mubr.msk.bf16.vlgmr.msra.gmra.mrb[4].mxu1 %vm89_vm1, %v360_v50 }
 0x386   :  { %v437_v52 = vpop.f32.mrb[4].mxu1 }
 0x387   :  { %v438_v53 = vadd.f32 %v484_v51, %v437_v52  ;;  %v580_v54 = vpop.f32.mrb[5].mxu1 }
 0x388   :  { %v440_v55 = vpop.f32.mrb[6].mxu1 }
 0x389   :  { %v443_v56 = vpack.c.bf16 %v438_v53, %v438_v53  ;;  %v581_v57 = vpop.f32.mrb[7].mxu1 }
 0x38b   :  { %444 = vst [vmem:[#allocation5] sm:$0xf] %v443_v56 }
 0x38c   :  { %645 = shalt.err (!%p642_p12)
}
 0x38d   :  { %s646_s8 = scalar_lea.hbm %s858_s9, 64 }
 0x38e   :  { %p647_p13 = scmp.ne.s32.totalorder %s858_s9, %s646_s8  ;;  %p650_p0 = scmp.lt.u32.totalorder %s646_s8, %s858_s9 }
 0x390   :  { %p652_p1 = pnand %p650_p0, %p647_p13 }
 0x392   :  { %655 = shalt.err (!%p652_p1)
}
 0x393   :  { %454 = dma.vmem_to_hbm [thread:$0]  %s452_s22, 64, %s858_s9, [#allocation4]  }
 0x394   :  { %658 = dma.done.wait [#allocation4], 64  }
 0x395   :  { %659 = vsyncadd [#allocation4], 4294967232 }
 0x396   :  { %458 = vsyncpa [#allocation3], 1 }
 0x397   :  { %459 = vsyncpa [#allocation4], 1 }

</bundles_post_ra>
